<compile_context>
chip_gen: v5e
topology: v5e:2x2
jax: 0.10.0
libtpu: 0.0.40
codegen_flags: <defaults>
</compile_context>

<pallas_src>
import jax
import jax.numpy as jnp
from jax.experimental import pallas as pl
from jax.experimental.pallas import tpu as pltpu

LEAKY_SLOPE = 0.01   # F.leaky_relu default negative_slope
LANE = 128           # TPU lane width
MXU_ROWS = 256       # v6e/v7x MXU row granularity
VMEM_BUDGET = 24 * 1024 * 1024   # stay well inside the 32 MiB scoped limit (v7x-safe)


def _round_up(n, m):
    return ((n + m - 1) // m) * m


def _mlp_kernel(x_ref, w1_ref, b1_ref, w2_ref, b2_ref, w3_ref, b3_ref, o_ref):
    out_w = o_ref.shape[-1]            # 2 (true output width)
    rows = x_ref.shape[0]

    # Weights/biases loaded once per grid step; shared by both row-halves.
    w1 = w1_ref[...]; b1 = b1_ref[...]
    w2 = w2_ref[...]; b2 = b2_ref[...]
    w3 = w3_ref[...]; b3 = b3_ref[...]

    def mlp(xv):
        # (r, dx) @ (dx, 128) + (1, 128)
        h1 = jnp.dot(xv, w1, preferred_element_type=jnp.float32) + b1
        a1 = jnp.maximum(h1, LEAKY_SLOPE * h1)            # leaky_relu, single vmax
        # (r, 128) @ (128, 128)
        h2 = jnp.dot(a1.astype(w2.dtype), w2, preferred_element_type=jnp.float32) + b2
        a2 = jnp.maximum(h2, LEAKY_SLOPE * h2)
        # (r, 128) @ (128, 128)  -- compute 128-wide, store only the 2 real cols
        h3 = jnp.dot(a2.astype(w3.dtype), w3, preferred_element_type=jnp.float32) + b3
        return h3[:, :out_w].astype(o_ref.dtype)

    if rows % 512 == 0:
        # Two independent row-halves: MXU phase of one half overlaps the
        # VPU leaky_relu / cast phase of the other (scheduler interleaves).
        half = rows // 2
        o_ref[:half, :] = mlp(x_ref[:half, :])
        o_ref[half:, :] = mlp(x_ref[half:, :])
    else:
        o_ref[...] = mlp(x_ref[...])


def _pad_params(params, use_bf16):
    """Zero-pad hidden (100->128) and output (2->128) dims; optionally bf16 weights.

    Biases stay f32 (accumulation/activation precision).  Zero padding is exact:
    padded weight columns/rows and bias entries are 0 and leaky_relu(0) == 0.
    """
    w1, b1 = params["w1"], params["b1"]
    w2, b2 = params["w2"], params["b2"]
    w3, b3 = params["w3"], params["b3"]
    h_pad = _round_up(w1.shape[1], LANE)   # 100 -> 128
    o_pad = _round_up(w3.shape[1], LANE)   # 2   -> 128
    wdt = jnp.bfloat16 if use_bf16 else jnp.float32

    def pad2(a, rows, cols):
        return jnp.pad(a, ((0, rows - a.shape[0]), (0, cols - a.shape[1])))

    return {
        "w1": pad2(w1, w1.shape[0], h_pad).astype(wdt),
        "b1": pad2(b1, 1, h_pad).astype(jnp.float32),
        "w2": pad2(w2, h_pad, h_pad).astype(wdt),
        "b2": pad2(b2, 1, h_pad).astype(jnp.float32),
        "w3": pad2(w3, h_pad, o_pad).astype(wdt),
        "b3": pad2(b3, 1, o_pad).astype(jnp.float32),
    }


def _vmem_estimate(bt, dim_x, out_w, x_bytes, w_bytes):
    """Rough VMEM bytes: double-buffered I/O tiles + resident weights + f32 temps."""
    weights = 2 * ((dim_x * LANE + 2 * LANE * LANE) * w_bytes + 3 * LANE * 4)
    io = 2 * bt * dim_x * x_bytes + 2 * bt * out_w * 4
    inter = 6 * bt * LANE * 4          # generous bound on live f32 intermediates
    return weights + io + inter


def simple_mean_y_network(x, params, *, batch_tile=2048, use_bf16=True):
    """Forward pass of SimpleMeanYNetwork (quadratic=False).

    x:       (B, dim_x) float32, arbitrary B (no host-side padding required)
    params:  dict with w1 (dim_x,100), b1 (1,100), w2 (100,100), b2 (1,100),
             w3 (100,2), b3 (1,2)   -- all float32, weights already (in, out).
    returns: (B, 2) float32
    """
    B, dim_x = x.shape
    out_dim = params["w3"].shape[1]            # 2

    p = _pad_params(params, use_bf16)
    x_dtype = jnp.bfloat16 if use_bf16 else jnp.float32
    x_bytes = 2 if use_bf16 else 4
    w_bytes = 2 if use_bf16 else 4

    # ---- batch tile selection -------------------------------------------------
    if B < 2 * MXU_ROWS:
        # Tiny batch: one exact full-array block (no padding, no OOB rows,
        # no per-step overhead multiplication).
        bt = B
    else:
        if B <= batch_tile:
            # Split into >= 2 steps of >= 256 rows each (keeps v7x's 2nd TC busy
            # without generating tiny ragged MXU passes).
            bt = _round_up(pl.cdiv(B, 2), MXU_ROWS)
        else:
            bt = max(MXU_ROWS, (batch_tile // MXU_ROWS) * MXU_ROWS)
        # Cap the tile so buffers fit comfortably in VMEM (v7x has 64 MiB total).
        while bt > MXU_ROWS and _vmem_estimate(bt, dim_x, out_dim,
                                               x_bytes, w_bytes) > VMEM_BUDGET:
            bt -= MXU_ROWS

    grid = (pl.cdiv(B, bt),)   # partial last block handled by Pallas (OOB writes dropped)

    x_comp = x.astype(x_dtype)

    def full(arr):
        return pl.BlockSpec(arr.shape, lambda i: (0, 0))

    return pl.pallas_call(
        _mlp_kernel,
        out_shape=jax.ShapeDtypeStruct((B, out_dim), jnp.float32),
        grid_spec=pltpu.PrefetchScalarGridSpec(
            num_scalar_prefetch=0,
            grid=grid,
            in_specs=[
                pl.BlockSpec((bt, dim_x), lambda i: (i, 0)),
                full(p["w1"]), full(p["b1"]),
                full(p["w2"]), full(p["b2"]),
                full(p["w3"]), full(p["b3"]),
            ],
            out_specs=pl.BlockSpec((bt, out_dim), lambda i: (i, 0)),
        ),
        compiler_params=pltpu.CompilerParams(
            dimension_semantics=("parallel",),
            vmem_limit_bytes=32 * 1024 * 1024,
        ),
    )(x_comp, p["w1"], p["b1"], p["w2"], p["b2"], p["w3"], p["b3"])


def init_params(dim_x, key):
    """Deterministic synthetic parameters matching nn.Linear shapes
    (stored transposed, i.e. (in, out))."""
    k1, k2, k3, k4, k5, k6 = jax.random.split(key, 6)
    scale = 0.1
    return {
        "w1": scale * jax.random.normal(k1, (dim_x, 100), jnp.float32),
        "b1": scale * jax.random.normal(k2, (1, 100), jnp.float32),
        "w2": scale * jax.random.normal(k3, (100, 100), jnp.float32),
        "b2": scale * jax.random.normal(k4, (1, 100), jnp.float32),
        "w3": scale * jax.random.normal(k5, (100, 2), jnp.float32),
        "b3": scale * jax.random.normal(k6, (1, 2), jnp.float32),
    }


def _reference(x, p):
    def lrelu(v):
        return jnp.where(v > 0, v, LEAKY_SLOPE * v)
    h = x @ p["w1"] + p["b1"]
    h = lrelu(h) @ p["w2"] + p["b2"]
    h = lrelu(h) @ p["w3"] + p["b3"]
    return h


if __name__ == "__main__":
    dim_x = 16
    key = jax.random.PRNGKey(0)
    kx, kp = jax.random.split(key)
    params = init_params(dim_x, kp)

    # 1) small batch, single exact full-array block, strict f32 check
    x = jax.random.normal(kx, (16, dim_x), jnp.float32)
    out = jax.block_until_ready(simple_mean_y_network(x, params, use_bf16=False))
    assert out.shape == (16, 2)
    assert jnp.allclose(out, _reference(x, params), atol=1e-5, rtol=1e-5), "f32 small-batch mismatch"

    # 2) odd tiny batch (exact block path, no padding needed)
    x2 = jax.random.normal(kx, (19, dim_x), jnp.float32)
    out2 = jax.block_until_ready(simple_mean_y_network(x2, params, use_bf16=False))
    assert out2.shape == (19, 2)
    assert jnp.allclose(out2, _reference(x2, params), atol=1e-5, rtol=1e-5), "odd-batch mismatch"

    # 3) multi-step grid with a partial last block + in-kernel 2-way interleave, strict f32
    x3 = jax.random.normal(kx, (1100, dim_x), jnp.float32)
    out3 = jax.block_until_ready(
        simple_mean_y_network(x3, params, batch_tile=512, use_bf16=False))
    assert out3.shape == (1100, 2)
    assert jnp.allclose(out3, _reference(x3, params), atol=1e-5, rtol=1e-5), "tiled-path mismatch"

    # 4) production default path (bf16 inputs/weights), loose tolerance
    out4 = jax.block_until_ready(simple_mean_y_network(x3, params, batch_tile=512))
    assert out4.shape == (1100, 2)
    assert jnp.allclose(out4, _reference(x3, params), atol=1e-1, rtol=1e-1), "bf16-path mismatch"

    print("KERNEL_OK")
</pallas_src>

<mosaic_0001>
module attributes {stable_mosaic.version = 11 : i64} {
  func.func @_mlp_kernel(%arg0: i32, %arg1: memref<16x16xf32, #tpu.memory_space<vmem>>, %arg2: memref<16x128xf32, #tpu.memory_space<vmem>>, %arg3: memref<1x128xf32, #tpu.memory_space<vmem>>, %arg4: memref<128x128xf32, #tpu.memory_space<vmem>>, %arg5: memref<1x128xf32, #tpu.memory_space<vmem>>, %arg6: memref<128x128xf32, #tpu.memory_space<vmem>>, %arg7: memref<1x128xf32, #tpu.memory_space<vmem>>, %arg8: memref<16x2xf32, #tpu.memory_space<vmem>>) attributes {dimension_semantics = [#tpu.dimension_semantics<parallel>], iteration_bounds = array<i64: 1>, scalar_prefetch = 0 : i64, scratch_operands = 0 : i64, tpu.core_type = #tpu.core_type<tc>, window_params = [{transform_indices = @transform_0, window_bounds = array<i64: 16, 16>}, {pipeline_mode = #tpu.pipeline_mode<synchronous>, transform_indices = @transform_1, window_bounds = array<i64: 16, 128>}, {pipeline_mode = #tpu.pipeline_mode<synchronous>, transform_indices = @transform_2, window_bounds = array<i64: 1, 128>}, {pipeline_mode = #tpu.pipeline_mode<synchronous>, transform_indices = @transform_3, window_bounds = array<i64: 128, 128>}, {pipeline_mode = #tpu.pipeline_mode<synchronous>, transform_indices = @transform_4, window_bounds = array<i64: 1, 128>}, {pipeline_mode = #tpu.pipeline_mode<synchronous>, transform_indices = @transform_5, window_bounds = array<i64: 128, 128>}, {pipeline_mode = #tpu.pipeline_mode<synchronous>, transform_indices = @transform_6, window_bounds = array<i64: 1, 128>}, {transform_indices = @transform_7, window_bounds = array<i64: 16, 2>}]} {
    %c0 = arith.constant 0 : index
    %c0_0 = arith.constant 0 : index
    %0 = vector.load %arg2[%c0, %c0_0] : memref<16x128xf32, #tpu.memory_space<vmem>>, vector<16x128xf32>
    %c0_1 = arith.constant 0 : index
    %c0_2 = arith.constant 0 : index
    %1 = vector.load %arg3[%c0_1, %c0_2] : memref<1x128xf32, #tpu.memory_space<vmem>>, vector<1x128xf32>
    %c0_3 = arith.constant 0 : index
    %c0_4 = arith.constant 0 : index
    %2 = vector.load %arg4[%c0_3, %c0_4] : memref<128x128xf32, #tpu.memory_space<vmem>>, vector<128x128xf32>
    %c0_5 = arith.constant 0 : index
    %c0_6 = arith.constant 0 : index
    %3 = vector.load %arg5[%c0_5, %c0_6] : memref<1x128xf32, #tpu.memory_space<vmem>>, vector<1x128xf32>
    %c0_7 = arith.constant 0 : index
    %c0_8 = arith.constant 0 : index
    %4 = vector.load %arg6[%c0_7, %c0_8] : memref<128x128xf32, #tpu.memory_space<vmem>>, vector<128x128xf32>
    %c0_9 = arith.constant 0 : index
    %c0_10 = arith.constant 0 : index
    %5 = vector.load %arg7[%c0_9, %c0_10] : memref<1x128xf32, #tpu.memory_space<vmem>>, vector<1x128xf32>
    %c0_11 = arith.constant 0 : index
    %c0_12 = arith.constant 0 : index
    %6 = vector.load %arg1[%c0_11, %c0_12] : memref<16x16xf32, #tpu.memory_space<vmem>>, vector<16x16xf32>
    %cst = arith.constant dense<0.000000e+00> : vector<16x128xf32>
    %7 = tpu.matmul %6, %0, %cst {dimension_numbers = #tpu.dot_dimension_numbers<[1], [0], [0], [1], [0, 0, 1, 1], [], []>} : vector<16x16xf32>, vector<16x128xf32>, vector<16x128xf32> -> vector<16x128xf32>
    %8 = vector.broadcast %1 : vector<1x128xf32> to vector<16x128xf32>
    %9 = arith.addf %7, %8 : vector<16x128xf32>
    %cst_13 = arith.constant 0.00999999977 : f32
    %10 = vector.broadcast %cst_13 : f32 to vector<16x128xf32>
    %11 = arith.mulf %10, %9 : vector<16x128xf32>
    %12 = arith.maximumf %9, %11 : vector<16x128xf32>
    %cst_14 = arith.constant dense<0.000000e+00> : vector<16x128xf32>
    %13 = tpu.matmul %12, %2, %cst_14 {dimension_numbers = #tpu.dot_dimension_numbers<[1], [0], [0], [1], [0, 0, 1, 1], [], []>} : vector<16x128xf32>, vector<128x128xf32>, vector<16x128xf32> -> vector<16x128xf32>
    %14 = vector.broadcast %3 : vector<1x128xf32> to vector<16x128xf32>
    %15 = arith.addf %13, %14 : vector<16x128xf32>
    %cst_15 = arith.constant 0.00999999977 : f32
    %16 = vector.broadcast %cst_15 : f32 to vector<16x128xf32>
    %17 = arith.mulf %16, %15 : vector<16x128xf32>
    %18 = arith.maximumf %15, %17 : vector<16x128xf32>
    %cst_16 = arith.constant dense<0.000000e+00> : vector<16x128xf32>
    %19 = tpu.matmul %18, %4, %cst_16 {dimension_numbers = #tpu.dot_dimension_numbers<[1], [0], [0], [1], [0, 0, 1, 1], [], []>} : vector<16x128xf32>, vector<128x128xf32>, vector<16x128xf32> -> vector<16x128xf32>
    %20 = vector.broadcast %5 : vector<1x128xf32> to vector<16x128xf32>
    %21 = arith.addf %19, %20 : vector<16x128xf32>
    %22 = vector.extract_strided_slice %21 {offsets = [0, 0], sizes = [16, 2], strides = [1, 1]} : vector<16x128xf32> to vector<16x2xf32>
    %c0_17 = arith.constant 0 : index
    %c0_18 = arith.constant 0 : index
    %23 = vector.load %arg8[%c0_17, %c0_18] : memref<16x2xf32, #tpu.memory_space<vmem>>, vector<16x2xf32>
    tpu.vector_store %arg8[%c0_17, %c0_18], %22 {strides = array<i32>} : memref<16x2xf32, #tpu.memory_space<vmem>>, vector<16x2xf32>,
    return
  }
  func.func @transform_0(%arg0: i32) -> (i32, i32) {
    %c0_i32 = arith.constant 0 : i32
    %c0_i32_0 = arith.constant 0 : i32
    return %arg0, %c0_i32 : i32, i32
  }
  func.func @transform_1(%arg0: i32) -> (i32, i32) {
    %c0_i32 = arith.constant 0 : i32
    %c0_i32_0 = arith.constant 0 : i32
    %c0_i32_1 = arith.constant 0 : i32
    return %c0_i32, %c0_i32_0 : i32, i32
  }
  func.func @transform_2(%arg0: i32) -> (i32, i32) {
    %c0_i32 = arith.constant 0 : i32
    %c0_i32_0 = arith.constant 0 : i32
    %c0_i32_1 = arith.constant 0 : i32
    return %c0_i32, %c0_i32_0 : i32, i32
  }
  func.func @transform_3(%arg0: i32) -> (i32, i32) {
    %c0_i32 = arith.constant 0 : i32
    %c0_i32_0 = arith.constant 0 : i32
    %c0_i32_1 = arith.constant 0 : i32
    return %c0_i32, %c0_i32_0 : i32, i32
  }
  func.func @transform_4(%arg0: i32) -> (i32, i32) {
    %c0_i32 = arith.constant 0 : i32
    %c0_i32_0 = arith.constant 0 : i32
    %c0_i32_1 = arith.constant 0 : i32
    return %c0_i32, %c0_i32_0 : i32, i32
  }
  func.func @transform_5(%arg0: i32) -> (i32, i32) {
    %c0_i32 = arith.constant 0 : i32
    %c0_i32_0 = arith.constant 0 : i32
    %c0_i32_1 = arith.constant 0 : i32
    return %c0_i32, %c0_i32_0 : i32, i32
  }
  func.func @transform_6(%arg0: i32) -> (i32, i32) {
    %c0_i32 = arith.constant 0 : i32
    %c0_i32_0 = arith.constant 0 : i32
    %c0_i32_1 = arith.constant 0 : i32
    return %c0_i32, %c0_i32_0 : i32, i32
  }
  func.func @transform_7(%arg0: i32) -> (i32, i32) {
    %c0_i32 = arith.constant 0 : i32
    %c0_i32_0 = arith.constant 0 : i32
    return %arg0, %c0_i32 : i32, i32
  }
}

</mosaic_0001>

<bundles_post_ra>
// kernel: tpu_custom_call.1
= control target key start
LH: loop header
LB: loop body
LE: loop exit
PB: predicated region body
PF: predicated region fallthrough
CT: control target
= control target key end

     0   :  { %12 = vsyncpa [#allocation3], 0  ;;  %s451_s0 = inlined_call_operand.hbm [shape: f32[16,16], index: 0, kind: input, shape index: {}]   ;;  %s452_s1 = inlined_call_operand.hbm [shape: f32[16,128], index: 1, kind: input, shape index: {}]   ;;  %s453_s2 = inlined_call_operand.vmem [shape: f32[1,128], index: 2, kind: input, shape index: {}]   ;;  %s454_s3 = inlined_call_operand.hbm [shape: f32[128,128], index: 3, kind: input, shape index: {}]   ;;  %s455_s4 = inlined_call_operand.vmem [shape: f32[1,128], index: 4, kind: input, shape index: {}]   ;;  %s456_s5 = inlined_call_operand.hbm [shape: f32[128,128], index: 5, kind: input, shape index: {}]   ;;  %s457_s6 = inlined_call_operand.vmem [shape: f32[1,128], index: 6, kind: input, shape index: {}]   ;;  %s458_s7 = inlined_call_operand.vmem [shape: f32[16,2], index: 7, kind: output, shape index: {}]  }
   0x1   :  { %13 = vsyncpa [#allocation5], 0 }
   0x2   :  { %14 = vsyncpa [#allocation8], 0  ;;  %s32_s26 = sshll.u32 %s452_s1, 4  ;;  %s376_s27 = smov [#allocation4]   ;;  %s33_s26 = int_to_ptr.hbm [resolvable:$true] %s32_s26 }
   0x3   :  { %s34_s28 = sshll.u32 %s376_s27, 4  ;;  %s19_s8 = sshll.u32 %s451_s0, 4  ;;  %s35_s28 = int_to_ptr.vmem [resolvable:$true] %s34_s28  ;;  %s20_s8 = int_to_ptr.hbm [resolvable:$true] %s19_s8 }
   0x4   :  { %s377_s9 = smov 128   ;;  %s378_s10 = smov 8  }
   0x5   :  { %40 = dma.hbm_to_vmem [thread:$0]  %s33_s26, 256, %s35_s28, [#allocation5], %s377_s9, %s377_s9, %s378_s10  }
   0x6   :  { %s379_s11 = smov [#allocation2]   ;;  %s47_s15 = sshll.u32 %s454_s3, 4  ;;  %s48_s15 = int_to_ptr.hbm [resolvable:$true] %s47_s15 }
   0x7   :  { %s21_s12 = sshll.u32 %s379_s11, 4  ;;  %s62_s17 = sshll.u32 %s456_s5, 4  ;;  %s22_s12 = int_to_ptr.vmem [resolvable:$true] %s21_s12  ;;  %s63_s17 = int_to_ptr.hbm [resolvable:$true] %s62_s17 }
   0x8   :  { %27 = dma.hbm_to_vmem [thread:$0]  %s20_s8, 256, %s22_s12, [#allocation3], %s377_s9, %s377_s9, %s378_s10  }
   0x9   :  { %s380_s18 = smov [#allocation6]   ;;  %s381_s0 = smov [#allocation7]  }
   0xa   :  { %s49_s19 = sshll.u32 %s380_s18, 4  ;;  %s64_s20 = sshll.u32 %s381_s0, 4  ;;  %s50_s19 = int_to_ptr.vmem [resolvable:$true] %s49_s19  ;;  %s65_s20 = int_to_ptr.vmem [resolvable:$true] %s64_s20 }
   0xb   :  { %55 = dma.hbm_to_vmem [thread:$0]  %s48_s15, 2048, %s50_s19, [#allocation5], %s377_s9, %s377_s9, %s378_s10  }
   0xc   :  { %70 = dma.hbm_to_vmem [thread:$0]  %s63_s17, 2048, %s65_s20, [#allocation8], %s377_s9, %s377_s9, %s378_s10  }
   0xd   :  { %370 = dma.done.wait [#allocation3], 256  }
   0xe   :  { %371 = vsyncadd [#allocation3], 4294967040 }
   0xf   :  { %372 = dma.done.wait [#allocation5], 2304  }
  0x10   :  { %373 = vsyncadd [#allocation5], 4294964992 }
  0x11   :  { %374 = dma.done.wait [#allocation8], 2048  }
  0x12   :  { %375 = vsyncadd [#allocation8], 4294965248  ;;  %v90_v0 = vld [vmem:[#allocation4 + $0x8] sm:$0xff]  ;;  %v89_v1 = vld [vmem:[#allocation4] sm:$0xff]  ;;  %vm131_vm0 = vcmask 130048   ;;  %vm221_vm1 = vcmask 15360  }
  0x13   :  { %152 = vmatpush.msra.mxu0 %v90_v0  ;;  %v126_v2 = vld [vmem:[#allocation2] sm:$0xff]  ;;  %v107_v3 = vld [vmem:[#allocation6 + $0x78] sm:$0xff]  ;;  %v106_v4 = vld [vmem:[#allocation6 + $0x70] sm:$0xff] }
  0x14   :  { %168 = vmatpush.msra.mxu1 %v107_v3  ;;  %233 = vmatpush.msra.mxu3 %v107_v3  ;;  %v105_v5 = vld [vmem:[#allocation6 + $0x68] sm:$0xff]  ;;  %v104_v6 = vld [vmem:[#allocation6 + $0x60] sm:$0xff]  ;;  %v103_v7 = vld [vmem:[#allocation6 + $0x58] sm:$0xff] }
  0x15   :  { %153 = vmatpush.msra.mxu0 %v89_v1  ;;  %v127_v8 = vld [vmem:[#allocation2 + $0x8] sm:$0xff]  ;;  %v102_v9 = vld [vmem:[#allocation6 + $0x50] sm:$0xff]  ;;  %v100_v11 = vld [vmem:[#allocation6 + $0x40] sm:$0xff] }
  0x16   :  { %231 = vmatmul.msk.f32.vlgmr.msra.gmra.mxu0 %vm131_vm0, %v126_v2  ;;  %169 = vmatpush.msra.mxu1 %v106_v4  ;;  %v101_v10 = vld [vmem:[#allocation6 + $0x48] sm:$0xff]  ;;  %v99_v12 = vld [vmem:[#allocation6 + $0x38] sm:$0xff]  ;;  %v98_v13 = vld [vmem:[#allocation6 + $0x30] sm:$0xff] }
  0x17   :  { %234 = vmatpush.msra.mxu3 %v106_v4  ;;  %v97_v14 = vld [vmem:[#allocation6 + $0x28] sm:$0xff]  ;;  %v96_v15 = vld [vmem:[#allocation6 + $0x20] sm:$0xff]  ;;  %v95_v16 = vld [vmem:[#allocation6 + $0x18] sm:$0xff] }
  0x18   :  { %170 = vmatpush.msra.mxu1 %v105_v5  ;;  %v94_v17 = vld [vmem:[#allocation6 + $0x10] sm:$0xff]  ;;  %v93_v18 = vld [vmem:[#allocation6 + $0x8] sm:$0xff]  ;;  %v92_v19 = vld [vmem:[#allocation6] sm:$0xff] }
  0x19   :  { %235 = vmatpush.msra.mxu3 %v105_v5  ;;  %v124_v20 = vld [vmem:[#allocation7 + $0x78] sm:$0xff]  ;;  %v123_v21 = vld [vmem:[#allocation7 + $0x70] sm:$0xff]  ;;  %v122_v22 = vld [vmem:[#allocation7 + $0x68] sm:$0xff] }
  0x1a   :  { %171 = vmatpush.msra.mxu1 %v104_v6  ;;  %198 = vmatpush.msrb.mxu0 %v124_v20  ;;  %v121_v23 = vld [vmem:[#allocation7 + $0x60] sm:$0xff]  ;;  %v120_v24 = vld [vmem:[#allocation7 + $0x58] sm:$0xff]  ;;  %v119_v25 = vld [vmem:[#allocation7 + $0x50] sm:$0xff] }
  0x1b   :  { %236 = vmatpush.msra.mxu3 %v104_v6  ;;  %249 = vmatpush.msra.mxu2 %v124_v20  ;;  %v118_v26 = vld [vmem:[#allocation7 + $0x48] sm:$0xff]  ;;  %v117_v27 = vld [vmem:[#allocation7 + $0x40] sm:$0xff]  ;;  %v116_v29 = vld [vmem:[#allocation7 + $0x38] sm:$0xff] }
  0x1c   :  { %172 = vmatpush.msra.mxu1 %v103_v7  ;;  %199 = vmatpush.msrb.mxu0 %v123_v21  ;;  %v271_v28 = vld [vmem:[%s453_s2] ss:$0 sm:$0xff]  ;;  %v115_v30 = vld [vmem:[#allocation7 + $0x30] sm:$0xff]  ;;  %v114_v33 = vld [vmem:[#allocation7 + $0x28] sm:$0xff] }
  0x1d   :  { %237 = vmatpush.msra.mxu3 %v103_v7  ;;  %250 = vmatpush.msra.mxu2 %v123_v21  ;;  %v113_v35 = vld [vmem:[#allocation7 + $0x20] sm:$0xff]  ;;  %v112_v41 = vld [vmem:[#allocation7 + $0x18] sm:$0xff]  ;;  %v111_v42 = vld [vmem:[#allocation7 + $0x10] sm:$0xff] }
  0x1e   :  { %232 = vmatmul.msk.f32.gmra.mxu0 %vm131_vm0, %v127_v8  ;;  %173 = vmatpush.msra.mxu1 %v102_v9  ;;  %v110_v43 = vld [vmem:[#allocation7 + $0x8] sm:$0xff]  ;;  %v109_v44 = vld [vmem:[#allocation7] sm:$0xff] }
  0x1f   :  { %238 = vmatpush.msra.mxu3 %v102_v9  ;;  %200 = vmatpush.msrb.mxu0 %v122_v22  ;;  %v272_v45 = vld [vmem:[%s455_s4] ss:$0 sm:$0xff] }
  0x20   :  { %174 = vmatpush.msra.mxu1 %v101_v10  ;;  %251 = vmatpush.msra.mxu2 %v122_v22  ;;  %v273_v54 = vld [vmem:[%s457_s6] ss:$0 sm:$0xff] }
  0x21   :  { %239 = vmatpush.msra.mxu3 %v101_v10  ;;  %201 = vmatpush.msrb.mxu0 %v121_v23 }
  0x22   :  { %175 = vmatpush.msra.mxu1 %v100_v11  ;;  %252 = vmatpush.msra.mxu2 %v121_v23 }
  0x23   :  { %240 = vmatpush.msra.mxu3 %v100_v11  ;;  %202 = vmatpush.msrb.mxu0 %v120_v24 }
  0x24   :  { %176 = vmatpush.msra.mxu1 %v99_v12  ;;  %253 = vmatpush.msra.mxu2 %v120_v24 }
  0x25   :  { %241 = vmatpush.msra.mxu3 %v99_v12  ;;  %203 = vmatpush.msrb.mxu0 %v119_v25 }
  0x26   :  { %177 = vmatpush.msra.mxu1 %v98_v13  ;;  %254 = vmatpush.msra.mxu2 %v119_v25 }
  0x27   :  { %242 = vmatpush.msra.mxu3 %v98_v13  ;;  %204 = vmatpush.msrb.mxu0 %v118_v26 }
  0x28   :  { %178 = vmatpush.msra.mxu1 %v97_v14  ;;  %255 = vmatpush.msra.mxu2 %v118_v26 }
  0x29   :  { %243 = vmatpush.msra.mxu3 %v97_v14  ;;  %205 = vmatpush.msrb.mxu0 %v117_v27 }
  0x2a   :  { %179 = vmatpush.msra.mxu1 %v96_v15  ;;  %256 = vmatpush.msra.mxu2 %v117_v27 }
  0x2b   :  { %244 = vmatpush.msra.mxu3 %v96_v15  ;;  %206 = vmatpush.msrb.mxu0 %v116_v29 }
  0x2c   :  { %180 = vmatpush.msra.mxu1 %v95_v16  ;;  %257 = vmatpush.msra.mxu2 %v116_v29 }
  0x2d   :  { %245 = vmatpush.msra.mxu3 %v95_v16  ;;  %207 = vmatpush.msrb.mxu0 %v115_v30 }
  0x2e   :  { %181 = vmatpush.msra.mxu1 %v94_v17  ;;  %258 = vmatpush.msra.mxu2 %v115_v30 }
  0x2f   :  { %246 = vmatpush.msra.mxu3 %v94_v17  ;;  %208 = vmatpush.msrb.mxu0 %v114_v33 }
  0x30   :  { %182 = vmatpush.msra.mxu1 %v93_v18  ;;  %259 = vmatpush.msra.mxu2 %v114_v33 }
  0x31   :  { %247 = vmatpush.msra.mxu3 %v93_v18  ;;  %209 = vmatpush.msrb.mxu0 %v113_v35 }
  0x32   :  { %183 = vmatpush.msra.mxu1 %v92_v19  ;;  %260 = vmatpush.msra.mxu2 %v113_v35 }
  0x33   :  { %248 = vmatpush.msra.mxu3 %v92_v19  ;;  %210 = vmatpush.msrb.mxu0 %v112_v41 }
  0x34   :  { %261 = vmatpush.msra.mxu2 %v112_v41 }
  0x35   :  { %211 = vmatpush.msrb.mxu0 %v111_v42 }
  0x36   :  { %262 = vmatpush.msra.mxu2 %v111_v42 }
  0x37   :  { %212 = vmatpush.msrb.mxu0 %v110_v43 }
  0x38   :  { %263 = vmatpush.msra.mxu2 %v110_v43 }
  0x39   :  { %213 = vmatpush.msrb.mxu0 %v109_v44 }
  0x3a   :  { %264 = vmatpush.msra.mxu2 %v109_v44 }
  0x93   :  { %v155_v31 = vpop.f32.mrf.mxu0 }
  0x94   :  { %v156_v32 = vadd.f32 %v271_v28, %v155_v31 }
  0x96   :  { %v161_v34 = vmul.f32 0.01, %v156_v32 }
  0x98   :  { %v163_v36 = vmax.f32 %v156_v32, %v161_v34 }
  0x9a   :  { %184 = vmatmul.f32.vlgmr.msra.gmra.mxu1 %v163_v36 }
  0x9b   :  { %v158_v37 = vpop.f32.mrf.mxu0 }
  0x9c   :  { %v159_v38 = vadd.f32 %v271_v28, %v158_v37 }
  0x9e   :  { %v162_v39 = vmul.f32 0.01, %v159_v38 }
  0xa0   :  { %v164_v40 = vmax.f32 %v159_v38, %v162_v39 }
  0xa2   :  { %187 = vmatmul.f32.vlgmr.msra.gmra.mxu3 %v164_v40 }
 0x117   :  { %v185_v46 = vpop.f32.mrf.mxu1 }
 0x118   :  { %v186_v47 = vadd.f32 %v272_v45, %v185_v46 }
 0x11a   :  { %v191_v48 = vmul.f32 0.01, %v186_v47 }
 0x11c   :  { %v193_v49 = vmax.f32 %v186_v47, %v191_v48 }
 0x11e   :  { %214 = vmatmul.f32.vlgmr.msrb.gmra.mxu0 %v193_v49 }
 0x125   :  { %v188_v50 = vpop.f32.mrf.mxu3 }
 0x126   :  { %v189_v51 = vadd.f32 %v272_v45, %v188_v50 }
 0x128   :  { %v192_v52 = vmul.f32 0.01, %v189_v51 }
 0x12a   :  { %v194_v53 = vmax.f32 %v189_v51, %v192_v52 }
 0x12c   :  { %217 = vmatmul.f32.vlgmr.msra.gmra.mxu2 %v194_v53 }
 0x19b   :  { %v215_v55 = vpop.f32.mrf.mxu0 }
 0x19c   :  { %v216_v56 = vadd.f32 %v273_v54, %v215_v55 }
 0x19e   :  { %222 = vst.msk [vmem:[%s458_s7] sm:$0xff] %vm221_vm1, %v216_v56 }
 0x1af   :  { %v218_v57 = vpop.f32.mrf.mxu2 }
 0x1b0   :  { %v219_v58 = vadd.f32 %v273_v54, %v218_v57 }
 0x1b2   :  { %223 = vst.msk [vmem:[%s458_s7 + $0x8] sm:$0xff] %vm221_vm1, %v219_v58 }
 0x1b3   :  { %228 = vsyncpa [#allocation3], 1 }
 0x1b4   :  { %229 = vsyncpa [#allocation5], 1 }
 0x1b5   :  { %230 = vsyncpa [#allocation8], 1 }

</bundles_post_ra>
